<compile_context>
chip_gen: v7x
topology: tpu7x:2x2x1
jax: 0.10.0
libtpu: 0.0.40
codegen_flags: <defaults>
</compile_context>

<pallas_src>
import functools

import jax
import jax.numpy as jnp
from jax.experimental import pallas as pl
from jax.experimental.pallas import tpu as pltpu


# ---------------------------------------------------------------------------
# Kernels
# ---------------------------------------------------------------------------

def _linear_hyper_kernel(*refs, include_bias, in_features):
    """3-D path: (bt, S, IN) @ (bt, IN, tn) (+ bias) -> (bt, S, tn)."""
    if include_bias:
        w_ref, b_ref, x_ref, o_ref = refs
    else:
        w_ref, x_ref, o_ref = refs
        b_ref = None
    w = w_ref[...]                                    # (bt, IN[+1], tn)
    if w.shape[1] != in_features:                     # misaligned-IN fallback
        w = w[:, :in_features, :]
    x = x_ref[...]                                    # (bt, S, IN)
    ct = jnp.promote_types(x.dtype, w.dtype)          # pin mixed-dtype behavior
    y = jnp.einsum("bsi,bio->bso", x.astype(ct), w.astype(ct),
                   preferred_element_type=jnp.float32)
    if include_bias:
        y = y + b_ref[...].astype(jnp.float32)        # (bt, 1, tn) broadcast
    o_ref[...] = y.astype(o_ref.dtype)


def _linear_hyper_gemv_kernel(*refs, include_bias, in_features):
    """2-D path (S == 1): dense (bt, tn) output via VPU mul + sublane reduce."""
    if include_bias:
        w_ref, b_ref, x_ref, o_ref = refs
    else:
        w_ref, x_ref, o_ref = refs
        b_ref = None
    w = w_ref[...]                                    # (bt, IN[+1], tn)
    if w.shape[1] != in_features:
        w = w[:, :in_features, :]
    x = x_ref[...]                                    # (bt, IN)
    # Broadcast-multiply + per-batch sublane reduce: keeps the output block
    # lane/sublane-dense and avoids a stream of 1-row MXU pushes.
    y = jnp.sum(x[:, :, None].astype(jnp.float32) * w.astype(jnp.float32),
                axis=1)                               # (bt, tn), f32 accumulate
    if include_bias:
        y = y + b_ref[...][:, 0, :].astype(jnp.float32)
    o_ref[...] = y.astype(o_ref.dtype)


# ---------------------------------------------------------------------------
# Tile selection
# ---------------------------------------------------------------------------

def _vmem_budget():
    """Return (vmem_limit_bytes, per-step block budget), generation-aware."""
    phys = None
    try:
        phys = int(pltpu.get_tpu_info().vmem_capacity_bytes)
    except Exception:
        phys = None
    if not phys or phys <= 0:
        phys = 64 * 1024 * 1024            # conservative default (v7x per-TC)
    if phys >= 100 * 1024 * 1024:          # v5e / v6e: 128 MiB physical
        limit = 100 * 1024 * 1024
    else:                                  # v7x: 64 MiB physical -> ~38 MiB
        limit = int(phys * 0.6)
    # Per-grid-step (single-buffer) working-set budget; BlockSpec
    # double-buffers every input/output and Mosaic needs scratch headroom.
    return limit, limit // 3


def _select_tiles(B, OUT, a, c, budget, *, min_bt, min_steps=4,
                  sublane_align_bt=False):
    """Pick (tn, bt).  Per-batch working-set bytes = a * tn + c."""
    per_batch_budget = budget // max(min_bt, 1)
    # (1) Prefer tn == OUT so each batch's weights are one contiguous HBM read.
    if OUT <= 256 or a * OUT + c <= per_batch_budget:
        tn = OUT
    else:
        tn = (max(per_batch_budget - c, 0) // max(a, 1)) // 256 * 256
        tn = max(256, min(tn, OUT))
        # TODO(synk): for huge IN or S, also tile those axes (K grid with f32
        # accumulator / S grid) instead of only shrinking tn.
    per_batch = a * tn + c
    bt_vmem = max(1, budget // max(per_batch, 1))
    bt_steps = -(-B // min_steps)          # keep >= ~min_steps pipeline stages
    bt = max(1, min(B, bt_vmem, max(min_bt, bt_steps)))
    if sublane_align_bt and bt < B and bt >= 8:
        bt = bt // 8 * 8                   # sublane-aligned partial batch block
    return int(tn), int(bt)


# ---------------------------------------------------------------------------
# Wrapper
# ---------------------------------------------------------------------------

def linear_hyper_forward(x, params, input_dim, output_dim, bias=True):
    """Pallas implementation of LinearHyper.forward.

    x:      (B, in) or (B, S, in)
    params: (B, in*out [+ out]) flat hyper-network parameters.
            Calling convention: pass bf16 params / x straight from the
            hyper-network to halve the dominant weight HBM stream; the kernel
            accumulates in f32 either way.
    """
    batch, p_len = params.shape
    rows = input_dim + 1 if bias else input_dim
    needed = rows * output_dim
    if p_len != needed:
        # TODO(synk): trailing extra hyper-params force a copying slice here;
        # pass exactly in*out(+out) columns to keep the wrapper copy-free.
        params = params[:, :needed]

    if x.ndim not in (2, 3):
        raise ValueError(f"Input shape of {x.shape} not valid in LinearHyper")
    gemv = x.ndim == 2

    B, IN, OUT = batch, input_dim, output_dim
    S = 1 if gemv else x.shape[1]
    assert x.shape[0] == B and x.shape[-1] == IN

    # Free, layout-preserving view of the flat params (weights = rows 0..IN-1).
    params_v = params.reshape(B, rows, OUT)
    # Sublane-aligned weight block when IN % 8 == 0; otherwise fall back to the
    # fused (IN+1)-row block and drop the bias row in-kernel.
    w_rows = IN if (not bias or IN % 8 == 0) else rows
    # Bias as its own (B, 1, OUT) operand (tiny copy: B*OUT elems) so the
    # weight block stays aligned and the kernel does no sub-tile slicing.
    bias_v = (params[:, IN * OUT: IN * OUT + OUT].reshape(B, 1, OUT)
              if bias else None)

    p_item = jnp.dtype(params.dtype).itemsize
    x_item = jnp.dtype(x.dtype).itemsize
    out_dtype = x.dtype
    o_item = jnp.dtype(out_dtype).itemsize

    vmem_limit, block_budget = _vmem_budget()
    # Per-batch working-set bytes as a function of tn: a * tn + c.
    a = w_rows * p_item + (p_item if bias else 0) + S * o_item
    a += IN * 4 if gemv else S * 4         # f32 intermediate / accumulator
    c = S * IN * x_item
    min_bt = min(8, B) if gemv else 1      # sublane-dense (bt, tn) GEMV output
    tn, bt = _select_tiles(B, OUT, a, c, block_budget,
                           min_bt=min_bt, sublane_align_bt=gemv)

    grid = (pl.cdiv(B, bt), pl.cdiv(OUT, tn))   # ragged tails handled by Pallas

    in_specs = [pl.BlockSpec((bt, w_rows, tn), lambda b, n: (b, 0, n))]
    operands = [params_v]
    if bias:
        in_specs.append(pl.BlockSpec((bt, 1, tn), lambda b, n: (b, 0, n)))
        operands.append(bias_v)
    if gemv:
        in_specs.append(pl.BlockSpec((bt, IN), lambda b, n: (b, 0)))
        out_specs = pl.BlockSpec((bt, tn), lambda b, n: (b, n))
        out_shape = jax.ShapeDtypeStruct((B, OUT), out_dtype)
        kernel = functools.partial(_linear_hyper_gemv_kernel,
                                   include_bias=bias, in_features=IN)
    else:
        in_specs.append(pl.BlockSpec((bt, S, IN), lambda b, n: (b, 0, 0)))
        out_specs = pl.BlockSpec((bt, S, tn), lambda b, n: (b, 0, n))
        out_shape = jax.ShapeDtypeStruct((B, S, OUT), out_dtype)
        kernel = functools.partial(_linear_hyper_kernel,
                                   include_bias=bias, in_features=IN)
    operands.append(x)

    bytes_accessed = int(B * (IN * OUT + (OUT if bias else 0)) * p_item
                         + x.size * x_item + B * S * OUT * o_item)

    return pl.pallas_call(
        kernel,
        out_shape=out_shape,
        grid=grid,
        in_specs=in_specs,
        out_specs=out_specs,
        compiler_params=pltpu.CompilerParams(
            dimension_semantics=("parallel", "parallel"),
            vmem_limit_bytes=vmem_limit,
        ),
        cost_estimate=pl.CostEstimate(
            flops=int(2 * B * S * IN * OUT),
            transcendentals=0,
            bytes_accessed=bytes_accessed,
        ),
    )(*operands)


# ---------------------------------------------------------------------------
# Reference + tests
# ---------------------------------------------------------------------------

def _reference(x, params, input_dim, output_dim, bias=True):
    batch = params.shape[0]
    w = params[:, : input_dim * output_dim].reshape(batch, input_dim, output_dim)
    xr = x if x.ndim == 3 else x[:, None, :]
    y = jnp.einsum("bsi,bio->bso",
                   xr.astype(jnp.float32), w.astype(jnp.float32))
    if bias:
        b = params[:, input_dim * output_dim: input_dim * output_dim + output_dim]
        y = y + b.reshape(batch, 1, output_dim).astype(jnp.float32)
    return y if x.ndim == 3 else y[:, 0, :]


if __name__ == "__main__":
    key = jax.random.PRNGKey(0)
    batch, seq, input_dim, output_dim = 4, 8, 32, 128

    k1, k2, k3, k4, k5 = jax.random.split(key, 5)
    params = jax.random.normal(
        k1, (batch, input_dim * output_dim + output_dim), dtype=jnp.float32)
    x3 = jax.random.normal(k2, (batch, seq, input_dim), dtype=jnp.float32)
    x2 = jax.random.normal(k3, (batch, input_dim), dtype=jnp.float32)

    # 3-D path, f32, with bias
    y3 = linear_hyper_forward(x3, params, input_dim, output_dim, bias=True)
    jax.block_until_ready(y3)
    ref3 = _reference(x3, params, input_dim, output_dim, bias=True)
    assert y3.shape == (batch, seq, output_dim)
    assert jnp.allclose(y3, ref3, atol=1e-4, rtol=1e-4)

    # 2-D path (batched GEMV, dense (B, OUT) output block), f32, with bias
    y2 = linear_hyper_forward(x2, params, input_dim, output_dim, bias=True)
    jax.block_until_ready(y2)
    ref2 = _reference(x2, params, input_dim, output_dim, bias=True)
    assert y2.shape == (batch, output_dim)
    assert jnp.allclose(y2, ref2, atol=1e-4, rtol=1e-4)

    # 3-D path, f32, no bias
    params_nb = params[:, : input_dim * output_dim]
    ynb = linear_hyper_forward(x3, params_nb, input_dim, output_dim, bias=False)
    jax.block_until_ready(ynb)
    refnb = _reference(x3, params_nb, input_dim, output_dim, bias=False)
    assert jnp.allclose(ynb, refnb, atol=1e-4, rtol=1e-4)

    # Ragged batch (B=5) exercising the cdiv tail blocks
    params5 = jax.random.normal(
        k4, (5, input_dim * output_dim + output_dim), dtype=jnp.float32)
    x5 = jax.random.normal(k5, (5, seq, input_dim), dtype=jnp.float32)
    y5 = linear_hyper_forward(x5, params5, input_dim, output_dim, bias=True)
    jax.block_until_ready(y5)
    ref5 = _reference(x5, params5, input_dim, output_dim, bias=True)
    assert jnp.allclose(y5, ref5, atol=1e-4, rtol=1e-4)

    # 3-D path in bf16 (halves the weight HBM stream; f32 accumulation)
    y3b = linear_hyper_forward(
        x3.astype(jnp.bfloat16), params.astype(jnp.bfloat16),
        input_dim, output_dim, bias=True)
    jax.block_until_ready(y3b)
    assert y3b.dtype == jnp.bfloat16
    assert jnp.allclose(y3b.astype(jnp.float32), ref3, atol=0.3, rtol=0.1)

    print("KERNEL_OK")
</pallas_src>

<mosaic_0001>
module attributes {stable_mosaic.version = 11 : i64} {
  func.func @_linear_hyper_kernel(%arg0: i32, %arg1: i32, %arg2: memref<1x32x128xf32, #tpu.memory_space<vmem>>, %arg3: memref<1x1x128xf32, #tpu.memory_space<vmem>>, %arg4: memref<1x8x32xf32, #tpu.memory_space<vmem>>, %arg5: memref<1x8x128xf32, #tpu.memory_space<vmem>>) attributes {dimension_semantics = [#tpu.dimension_semantics<parallel>, #tpu.dimension_semantics<parallel>], iteration_bounds = array<i64: 4, 1>, scalar_prefetch = 0 : i64, scratch_operands = 0 : i64, tpu.core_type = #tpu.core_type<tc>, window_params = [{transform_indices = @transform_0, window_bounds = array<i64: 1, 32, 128>}, {transform_indices = @transform_1, window_bounds = array<i64: 1, 1, 128>}, {transform_indices = @transform_2, window_bounds = array<i64: 1, 8, 32>}, {transform_indices = @transform_3, window_bounds = array<i64: 1, 8, 128>}]} {
    %c0 = arith.constant 0 : index
    %c0_0 = arith.constant 0 : index
    %c0_1 = arith.constant 0 : index
    %0 = vector.load %arg2[%c0, %c0_0, %c0_1] : memref<1x32x128xf32, #tpu.memory_space<vmem>>, vector<1x32x128xf32>
    %c0_2 = arith.constant 0 : index
    %c0_3 = arith.constant 0 : index
    %c0_4 = arith.constant 0 : index
    %1 = vector.load %arg4[%c0_2, %c0_3, %c0_4] : memref<1x8x32xf32, #tpu.memory_space<vmem>>, vector<1x8x32xf32>
    "tpu.trace_start"() <{level = 10 : i32, message = "bsi,bio->bso"}> : () -> ()
    %cst = arith.constant dense<0.000000e+00> : vector<1x8x128xf32>
    %2 = tpu.matmul %1, %0, %cst {dimension_numbers = #tpu.dot_dimension_numbers<[2], [1], [1], [2], [0, 0, 0, 1, 1, 2], [0], [0]>} : vector<1x8x32xf32>, vector<1x32x128xf32>, vector<1x8x128xf32> -> vector<1x8x128xf32>
    "tpu.trace_stop"() : () -> ()
    %c0_5 = arith.constant 0 : index
    %c0_6 = arith.constant 0 : index
    %c0_7 = arith.constant 0 : index
    %3 = vector.load %arg3[%c0_5, %c0_6, %c0_7] : memref<1x1x128xf32, #tpu.memory_space<vmem>>, vector<1x1x128xf32>
    %4 = vector.broadcast %3 : vector<1x1x128xf32> to vector<1x8x128xf32>
    %5 = arith.addf %2, %4 : vector<1x8x128xf32>
    %c0_8 = arith.constant 0 : index
    %c0_9 = arith.constant 0 : index
    %c0_10 = arith.constant 0 : index
    %6 = vector.load %arg5[%c0_8, %c0_9, %c0_10] : memref<1x8x128xf32, #tpu.memory_space<vmem>>, vector<1x8x128xf32>
    tpu.vector_store %arg5[%c0_8, %c0_9, %c0_10], %5 {strides = array<i32>} : memref<1x8x128xf32, #tpu.memory_space<vmem>>, vector<1x8x128xf32>,
    return
  }
  func.func @transform_0(%arg0: i32, %arg1: i32) -> (i32, i32, i32) {
    %c0_i32 = arith.constant 0 : i32
    %c0_i32_0 = arith.constant 0 : i32
    return %arg0, %c0_i32, %arg1 : i32, i32, i32
  }
  func.func @transform_1(%arg0: i32, %arg1: i32) -> (i32, i32, i32) {
    %c0_i32 = arith.constant 0 : i32
    %c0_i32_0 = arith.constant 0 : i32
    return %arg0, %c0_i32, %arg1 : i32, i32, i32
  }
  func.func @transform_2(%arg0: i32, %arg1: i32) -> (i32, i32, i32) {
    %c0_i32 = arith.constant 0 : i32
    %c0_i32_0 = arith.constant 0 : i32
    %c0_i32_1 = arith.constant 0 : i32
    return %arg0, %c0_i32, %c0_i32_0 : i32, i32, i32
  }
  func.func @transform_3(%arg0: i32, %arg1: i32) -> (i32, i32, i32) {
    %c0_i32 = arith.constant 0 : i32
    %c0_i32_0 = arith.constant 0 : i32
    return %arg0, %c0_i32, %arg1 : i32, i32, i32
  }
}

</mosaic_0001>

<bundles_post_ra>
// kernel: tpu_custom_call.1
= control target key start
LH: loop header
LB: loop body
LE: loop exit
PB: predicated region body
PF: predicated region fallthrough
CT: control target
= control target key end

     0   :  { %8 = vsyncpa [#allocation3], 0  ;;  %s753_s0 = inlined_call_operand.vmem [shape: f32[4,33,128], index: 0, kind: input, shape index: {}]   ;;  %s754_s1 = inlined_call_operand.vmem [shape: f32[4,1,128], index: 1, kind: input, shape index: {}]   ;;  %s755_s2 = inlined_call_operand.vmem [shape: f32[4,8,32], index: 2, kind: input, shape index: {}]   ;;  %s756_s3 = inlined_call_operand.hbm [shape: f32[4,8,128], index: 3, kind: output, shape index: {}]  }
   0x1   :  { %10 = vsyncpa [#allocation3 + $0x1], 0  ;;  %s635_s12 = smov 0   ;;  %s637_s13 = smov 0  }
   0x2   :  { %s639_s14 = smov 0   ;;  %s641_s15 = smov 0  }
   0x3   :  { %s643_s16 = smov 0   ;;  %s645_s17 = smov 0  }
   0x4 LB: > { %s436_s18 = sadd.s32 4294967295, %s609_s17   ;;  %s437_s19 = sadd.s32 4294967294, %s609_s17   ;;  %s609_s17 = sphi %s645_s17, %s16_s17   ;;  %s605_s16 = sphi %s643_s16, %s763_s16   ;;  %s601_s15 = sphi %s641_s15, %s762_s15   ;;  %s597_s14 = sphi %s639_s14, %s761_s14   ;;  %s593_s13 = sphi %s637_s13, %s760_s13   ;;  %s589_s12 = sphi %s635_s12, %s759_s12  }
   0x5   : > { %s28_s20 = sadd.s32 1, %s605_s16  ;;  %s119_s21 = sadd.s32 1, %s597_s14 }
   0x6   : > { %p30_p0 = scmp.ge.s32.totalorder %s28_s20, 4  ;;  %p129_p1 = scmp.ne.s32.totalorder %s597_s14, %s593_s13 }
   0x7   : > { %p130_p2 = scmp.eq.s32.totalorder %s436_s18, 3  ;;  %p135_p3 = scmp.ne.s32.totalorder %s593_s13, %s589_s12 }
   0x8   : > { %s765_s20 = smov (%p30_p0, %s28_s20), 0  ;;  %p136_p5 = scmp.eq.s32.totalorder %s437_s19, 3 }
   0x9   : > { %p675_p4 = por %p130_p2, %p129_p1  ;;  %s114_s23 = ssub.s32 %s605_s16, %s765_s20 }
   0xa   : > { %p440_p6 = scmp.ge.s32.totalorder %s609_s17, 1  ;;  %p117_p7 = scmp.eq.s32.totalorder %s114_s23, 0 }
   0xb   : > { %p682_p8 = por %p136_p5, %p135_p3  ;;  %p181_p9 = scmp.lt.s32.totalorder %s609_s17, 5 }
   0xc   : > { %s688_s25 = scalar_select %p117_p7, %s597_s14, %s119_s21  }
   0xd   : > { %p182_p10 = pnand %p440_p6, %p181_p9 }
   0xe   : > { %p218_p11 = scmp.lt.s32.totalorder (!%p182_p10), %s601_s15, 3  ;;  %v611_v0 = vmov (!%p182_p10), 0.0|0.0   ;;  %vm612_vm0 = vmmov (!%p182_p10), 0   ;;  %v613_v1 = vmov (!%p182_p10), 0.0   ;;  %vm248_vm1 = vcmask (!%p182_p10), 261120   ;;  %s215_s8 = sand.u32 (!%p182_p10), 1, %s593_s13  }
   0xf   : > { %185 = sbr.rel (%p182_p10) target bundleno = 265 (0x109), region = 32  ;;  %466 = vmatprep.subr.bf16.mxu0 (!%p182_p10), %v611_v0  ;;  %463 = vmatprep.mubr.msk.f32.mxu0 (!%p182_p10), %vm612_vm0, %v613_v1  ;;  %s441_s9 = sshll.u32 (!%p182_p10), %s215_s8, 3 }
  0x10   : > { %s447_s19 = sshll.u32 (!%p182_p10), %s601_s15, 7  ;;  %s217_s21 = scalar_lea.vmem (!%p182_p10), [#allocation2], %s441_s9 }
  0x11   : > { %s338_s23 = sshll.u32 (!%p182_p10), %s217_s21, 4  ;;  %s706_s29 = scalar_lea.hbm (!%p182_p10), %s756_s3, %s447_s19  ;;  %s708_s23 = int_to_ptr.vmem [resolvable:$true] %s338_s23 }
  0x16   : > { %s219_s26 = scalar_select %p218_p11, %s601_s15, 3 }
  0x17   : > { %s614_s15 = smov [#allocation2]  }
  0x18   : > { %s472_s27 = smul.u32 40, %s219_s26  ;;  %s443_s4 = sshll.u32 %s219_s26, 3 }
  0x19   : > { %s235_s7 = scalar_lea.vmem %s755_s2, %s443_s4  ;;  %s231_s18 = scalar_lea.vmem %s754_s1, %s219_s26 }
  0x1a   : > { %s225_s30 = scalar_lea.vmem %s753_s0, %s472_s27  ;;  %v240_v8 = vld [vmem:[%s235_s7] sm:$0xff]  ;;  %s531_s26 = scalar_lea.vmem %s708_s23, 128 }
  0x1b   : > { %v236_v2 = vld [vmem:[%s225_s30] sm:$0xff]  ;;  %v237_v3 = vld [vmem:[%s225_s30 + $0x8] sm:$0xff]  ;;  %v238_v4 = vld [vmem:[%s225_s30 + $0x10] sm:$0xff]  ;;  %p532_p12 = scmp.ne.s32.totalorder %s708_s23, %s531_s26  ;;  %s535_s4 = sshll.u32 %s614_s15, 4  ;;  %s536_s4 = int_to_ptr.vmem [resolvable:$false] %s535_s4 }
  0x1c   : > { %v467_v5 = vpack.c.bf16 %v237_v3, %v236_v2  ;;  %v239_v6 = vld [vmem:[%s225_s30 + $0x18] sm:$0xff]  ;;  %v444_v9 = vld [vmem:[%s231_s18] ss:$0 sm:$0xff]  ;;  %s324_s30 = scalar_lea.sflag [#allocation3], %s215_s8  ;;  %s537_s5 = scalar_lea.vmem %s536_s4, 256 }
  0x1d   : > { %v470_v7 = vpack.c.bf16 %v239_v6, %v238_v4  ;;  %p533_p13 = pnand %p532_p12, %p675_p4  ;;  %p538_p1 = scmp.lt.s32.totalorder %s708_s23, %s536_s4 }
  0x1e   : > { %468 = vmatpush3.bf16.msra.mxu0 %v467_v5  ;;  %p539_p2 = scmp.lt.s32.totalorder %s537_s5, %s531_s26 }
  0x1f   : > { %469 = vmatprep.subr.bf16.mxu0 %v611_v0  ;;  %p534_p0 = pneg %p533_p13 }
  0x20   : > { %p540_p3 = por %p539_p2, %p538_p1 }
  0x22   : > { %471 = vmatpush3.bf16.msra.mxu0 %v470_v7  ;;  %p541_p5 = pnand %p540_p3, %p534_p0 }
  0x25   : > { %464 = vmatmul.mubr.msk.f32.vlgmr.msra.gmra.mrb[0].mxu0 %vm248_vm1, %v240_v8 }
  0xf8   : > { %v318_v10 = vpop.f32.mrb[0].mxu0 }
  0xf9   : > { %v319_v11 = vadd.f32 %v444_v9, %v318_v10  ;;  %v465_v12 = vpop.f32.mrb[1].mxu0 }
  0xfb   : > { %322 = vst [vmem:[%s217_s21] sm:$0xff] %v319_v11 }
  0xfc   : > { %544 = shalt.err (!%p541_p5)
}
  0xfd   : > { %s545_s6 = scalar_lea.hbm %s706_s29, 128  ;;  %s549_s9 = scalar_lea.hbm %s756_s3, 512 }
  0xfe   : > { %p546_p6 = scmp.ne.s32.totalorder %s706_s29, %s545_s6  ;;  %p550_p10 = scmp.lt.u32.totalorder %s706_s29, %s756_s3 }
  0xff   : > { %p551_p11 = scmp.lt.u32.totalorder %s549_s9, %s545_s6  ;;  %p553_p13 = scmp.lt.u32.totalorder %s545_s6, %s706_s29 }
 0x100   : > { %p547_p7 = pnand %p546_p6, %p675_p4 }
 0x101   : > { %p552_p12 = por %p551_p11, %p550_p10 }
 0x102   : > { %p548_p9 = pneg %p547_p7 }
 0x103   : > { %p554_p0 = por %p553_p13, %p552_p12 }
 0x105   : > { %p555_p1 = pnand %p554_p0, %p548_p9 }
 0x107   : > { %558 = shalt.err (!%p555_p1)
}
 0x108   : > { %473 = dma.vmem_to_hbm [thread:$0]  (%p675_p4), %s708_s23, 128, %s706_s29, %s324_s30  }
 0x109 PF: > { %p479_p2 = scmp.ge.s32.totalorder %s609_s17, 2  ;;  %s350_s18 = sand.u32 1, %s589_s12  }
 0x10a   : > { %s351_s19 = scalar_lea.sflag [#allocation3], %s350_s18 }
 0x10b   : > { %p476_p3 = pnand %p479_p2, %p682_p8 }
 0x10d   : > { %584 = dma.done.wait (!%p476_p3), %s351_s19, 128  }
 0x10e   : > { %586 = vsyncadd (!%p476_p3), %s351_s19, 4294967168  ;;  %s16_s17 = sadd.s32 1, %s609_s17   ;;  %s759_s12 = smov %s593_s13 }
 0x10f   : > { %p13_p5 = scmp.ge.s32.totalorder %s16_s17, 6   ;;  %s760_s13 = smov %s597_s14 }
 0x110   : > { %s761_s14 = smov %s688_s25  ;;  %s762_s15 = smov %s605_s16 }
 0x111   : > { %s763_s16 = smov %s765_s20  ;;  %15 = sbr.rel (!%p13_p5) target bundleno = 4 (0x4), region = 73 }
 0x118   :  { %356 = vsyncpa [#allocation3], 1 }
 0x119   :  { %358 = vsyncpa [#allocation3 + $0x1], 1 }

</bundles_post_ra>
